<compile_context>
chip_gen: v7x
topology: tpu7x:2x2x1
jax: 0.10.0
libtpu: 0.0.40
codegen_flags: <defaults>
</compile_context>

<pallas_src>
import functools

import jax
import jax.numpy as jnp
from jax.experimental import pallas as pl
from jax.experimental.pallas import tpu as pltpu


def _general_attention_kernel(q_ref, w_ref, b_ref, v_ref, m_ref,
                              attn_ref, wgt_ref, *, mxu_dtype):
    q = q_ref[0]        # (Tq, Dq) f32
    w = w_ref[...]      # (Dq, Dv)
    b = b_ref[...]      # (1, Dv)
    v = v_ref[0]        # (Lv, Dv)

    # trans_query = W_s(query)  (small K; keep operands in input precision)
    tq = jnp.dot(q, w, preferred_element_type=jnp.float32) + b           # (Tq, Dv) f32

    # e = trans_query @ value^T, contracted directly on the feature axis so the
    # MXU consumes value without an XLU transpose. bf16 operands, f32 accumulate.
    v_mx = v.astype(mxu_dtype)
    e = jax.lax.dot_general(
        tq.astype(mxu_dtype), v_mx,
        dimension_numbers=(((1,), (1,)), ((), ())),
        preferred_element_type=jnp.float32)                               # (Tq, Lv) f32

    # masked_score: single select (masked positions -> -1e10), no extra add.
    keep = m_ref[0].astype(jnp.int32)                                     # int8 in HBM
    masked = jnp.where(keep == 0, jnp.float32(-1e10), e)

    # softmax(dim=-1), kept in f32 on all generations.
    mx = jnp.max(masked, axis=-1, keepdims=True)
    ex = jnp.exp(masked - mx)
    denom = jnp.sum(ex, axis=-1, keepdims=True)
    weight = ex * pl.reciprocal(denom, approx=True)                       # (Tq, Lv) f32

    # attention = weight @ value  (bf16 operands, f32 accumulate)
    attn = jnp.dot(weight.astype(mxu_dtype), v_mx,
                   preferred_element_type=jnp.float32)                    # (Tq, Dv) f32

    attn_ref[0] = attn.astype(attn_ref.dtype)
    wgt_ref[0] = weight.astype(wgt_ref.dtype)
    # NOTE: for production shapes, pad Lv to a multiple of 128 (or emit weight in
    # bf16) so the weight writeback uses unmasked, lane-dense stores.


def general_attention(query, value, mask, w_s, b_s, *, tq=256,
                      mxu_dtype=jnp.bfloat16):
    """query: (B, Lq, Dq)  value: (B, Lv, Dv)  mask: (B, Lq, Lv) (0.0 == masked out)
       w_s: (Dq, Dv) pre-transposed Linear weight   b_s: (Dv,)
       returns (attention (B, Lq, Dv), weight (B, Lq, Lv))"""
    B, Lq, Dq = query.shape
    _, Lv, Dv = value.shape

    # Lq tile: whole sequence if it fits one tile, else a 32-aligned tile
    # (32 keeps the int8 mask block sublane-tile aligned; also a multiple of 8).
    if tq >= Lq:
        tq = Lq
    else:
        tq = max(32, (tq // 32) * 32)
    num_q = pl.cdiv(Lq, tq)

    b2 = b_s.reshape(1, Dv)
    mask_i8 = (mask != 0).astype(jnp.int8)   # 1 = keep, 0 = masked; 4x smaller HBM read

    kernel = functools.partial(_general_attention_kernel, mxu_dtype=mxu_dtype)

    out_shapes = (
        jax.ShapeDtypeStruct((B, Lq, Dv), query.dtype),
        jax.ShapeDtypeStruct((B, Lq, Lv), query.dtype),
    )

    grid_spec = pltpu.PrefetchScalarGridSpec(
        num_scalar_prefetch=0,
        grid=(B, num_q),                                           # qi is innermost
        in_specs=[
            pl.BlockSpec((1, tq, Dq), lambda b, qi: (b, qi, 0)),   # query tile
            pl.BlockSpec((Dq, Dv), lambda b, qi: (0, 0)),          # shared weight
            pl.BlockSpec((1, Dv), lambda b, qi: (0, 0)),           # shared bias
            pl.BlockSpec((1, Lv, Dv), lambda b, qi: (b, 0, 0)),    # value: resident per batch
            pl.BlockSpec((1, tq, Lv), lambda b, qi: (b, qi, 0)),   # mask tile (int8)
        ],
        out_specs=[
            pl.BlockSpec((1, tq, Dv), lambda b, qi: (b, qi, 0)),   # attention
            pl.BlockSpec((1, tq, Lv), lambda b, qi: (b, qi, 0)),   # softmax weights
        ],
    )

    return pl.pallas_call(
        kernel,
        out_shape=out_shapes,
        grid_spec=grid_spec,
        compiler_params=pltpu.CompilerParams(
            dimension_semantics=("parallel", "parallel"),
            vmem_limit_bytes=48 * 1024 * 1024,   # double-buffering headroom incl. v7x
        ),
    )(query, w_s, b2, value, mask_i8)


def _reference(query, value, mask, w_s, b_s):
    tq = jnp.einsum("bld,de->ble", query, w_s) + b_s
    e = jnp.einsum("ble,bke->blk", tq, value)
    masked = jnp.where(mask == 0.0, -1e10, e)
    weight = jax.nn.softmax(masked, axis=-1)
    attention = jnp.einsum("blk,bke->ble", weight, value)
    return attention, weight


if __name__ == "__main__":
    key = jax.random.PRNGKey(0)
    B, Lq, Lv = 2, 64, 8
    query_size, value_size = 32, 32

    k_q, k_v, k_m, k_w, k_b = jax.random.split(key, 5)
    query = jax.random.normal(k_q, (B, Lq, query_size), dtype=jnp.float32)
    value = jax.random.normal(k_v, (B, Lv, value_size), dtype=jnp.float32)
    # binary mask (1.0 = keep, 0.0 = mask out), as the module expects
    mask = (jax.random.uniform(k_m, (B, Lq, Lv)) > 0.3).astype(jnp.float32)

    # deterministic Linear(query_size, value_size) params; stored as (Dq, Dv)
    bound = 1.0 / (query_size ** 0.5)
    w_s = jax.random.uniform(k_w, (query_size, value_size), minval=-bound, maxval=bound,
                             dtype=jnp.float32)
    b_s = jax.random.uniform(k_b, (value_size,), minval=-bound, maxval=bound,
                             dtype=jnp.float32)

    attn_ref, weight_ref = _reference(query, value, mask, w_s, b_s)

    # 1) f32 MXU operands with a tiled Lq axis (exercises the multi-step grid) — tight check.
    attn, weight = general_attention(query, value, mask, w_s, b_s,
                                     tq=32, mxu_dtype=jnp.float32)
    jax.block_until_ready((attn, weight))
    assert jnp.allclose(attn, attn_ref, atol=1e-2, rtol=1e-2), \
        f"attn f32 max err {jnp.max(jnp.abs(attn - attn_ref))}"
    assert jnp.allclose(weight, weight_ref, atol=1e-2, rtol=1e-2), \
        f"weight f32 max err {jnp.max(jnp.abs(weight - weight_ref))}"

    # 2) bf16 MXU operands (production fast path on v6e/v7x) — looser tolerance.
    attn_bf, weight_bf = general_attention(query, value, mask, w_s, b_s,
                                           mxu_dtype=jnp.bfloat16)
    jax.block_until_ready((attn_bf, weight_bf))
    assert jnp.allclose(attn_bf, attn_ref, atol=1e-1, rtol=1e-1), \
        f"attn bf16 max err {jnp.max(jnp.abs(attn_bf - attn_ref))}"
    assert jnp.allclose(weight_bf, weight_ref, atol=5e-2, rtol=5e-2), \
        f"weight bf16 max err {jnp.max(jnp.abs(weight_bf - weight_ref))}"

    print("KERNEL_OK")
</pallas_src>

<mosaic_0001>
module attributes {stable_mosaic.version = 11 : i64} {
  func.func @_general_attention_kernel(%arg0: i32, %arg1: i32, %arg2: memref<1x32x32xf32, #tpu.memory_space<vmem>>, %arg3: memref<32x32xf32, #tpu.memory_space<vmem>>, %arg4: memref<1x32xf32, #tpu.memory_space<vmem>>, %arg5: memref<1x8x32xf32, #tpu.memory_space<vmem>>, %arg6: memref<1x32x8xi8, #tpu.memory_space<vmem>>, %arg7: memref<1x32x32xf32, #tpu.memory_space<vmem>>, %arg8: memref<1x32x8xf32, #tpu.memory_space<vmem>>) attributes {dimension_semantics = [#tpu.dimension_semantics<parallel>, #tpu.dimension_semantics<parallel>], iteration_bounds = array<i64: 2, 2>, scalar_prefetch = 0 : i64, scratch_operands = 0 : i64, tpu.core_type = #tpu.core_type<tc>, window_params = [{transform_indices = @transform_0, window_bounds = array<i64: 1, 32, 32>}, {pipeline_mode = #tpu.pipeline_mode<synchronous>, transform_indices = @transform_1, window_bounds = array<i64: 32, 32>}, {pipeline_mode = #tpu.pipeline_mode<synchronous>, transform_indices = @transform_2, window_bounds = array<i64: 1, 32>}, {transform_indices = @transform_3, window_bounds = array<i64: 1, 8, 32>}, {transform_indices = @transform_4, window_bounds = array<i64: 1, 32, 8>}, {transform_indices = @transform_5, window_bounds = array<i64: 1, 32, 32>}, {transform_indices = @transform_6, window_bounds = array<i64: 1, 32, 8>}]} {
    %c0 = arith.constant 0 : index
    %c0_0 = arith.constant 0 : index
    %c0_1 = arith.constant 0 : index
    %0 = vector.load %arg2[%c0, %c0_0, %c0_1] : memref<1x32x32xf32, #tpu.memory_space<vmem>>, vector<1x32x32xf32>
    %1 = vector.shape_cast %0 : vector<1x32x32xf32> to vector<32x32xf32>
    %c0_2 = arith.constant 0 : index
    %c0_3 = arith.constant 0 : index
    %2 = vector.load %arg3[%c0_2, %c0_3] : memref<32x32xf32, #tpu.memory_space<vmem>>, vector<32x32xf32>
    %c0_4 = arith.constant 0 : index
    %c0_5 = arith.constant 0 : index
    %3 = vector.load %arg4[%c0_4, %c0_5] : memref<1x32xf32, #tpu.memory_space<vmem>>, vector<1x32xf32>
    %c0_6 = arith.constant 0 : index
    %c0_7 = arith.constant 0 : index
    %c0_8 = arith.constant 0 : index
    %4 = vector.load %arg5[%c0_6, %c0_7, %c0_8] : memref<1x8x32xf32, #tpu.memory_space<vmem>>, vector<1x8x32xf32>
    %5 = vector.shape_cast %4 : vector<1x8x32xf32> to vector<8x32xf32>
    %cst = arith.constant dense<0.000000e+00> : vector<32x32xf32>
    %6 = tpu.matmul %1, %2, %cst {dimension_numbers = #tpu.dot_dimension_numbers<[1], [0], [0], [1], [0, 0, 1, 1], [], []>} : vector<32x32xf32>, vector<32x32xf32>, vector<32x32xf32> -> vector<32x32xf32>
    %7 = vector.broadcast %3 : vector<1x32xf32> to vector<32x32xf32>
    %8 = arith.addf %6, %7 : vector<32x32xf32>
    %cst_9 = arith.constant dense<0.000000e+00> : vector<32x8xf32>
    %9 = tpu.matmul %8, %5, %cst_9 {dimension_numbers = #tpu.dot_dimension_numbers<[1], [1], [0], [0], [0, 0, 1, 0], [], []>} : vector<32x32xf32>, vector<8x32xf32>, vector<32x8xf32> -> vector<32x8xf32>
    %c0_10 = arith.constant 0 : index
    %c0_11 = arith.constant 0 : index
    %c0_12 = arith.constant 0 : index
    %10 = vector.load %arg6[%c0_10, %c0_11, %c0_12] : memref<1x32x8xi8, #tpu.memory_space<vmem>>, vector<1x32x8xi8>
    %11 = vector.shape_cast %10 : vector<1x32x8xi8> to vector<32x8xi8>
    %12 = arith.extsi %11 : vector<32x8xi8> to vector<32x8xi32>
    %c0_i32 = arith.constant 0 : i32
    %13 = vector.broadcast %c0_i32 : i32 to vector<32x8xi32>
    %14 = arith.cmpi eq, %12, %13 : vector<32x8xi32>
    %cst_13 = arith.constant -1.000000e+10 : f32
    %15 = vector.broadcast %cst_13 : f32 to vector<32x8xf32>
    %16 = arith.select %14, %15, %9 : vector<32x8xi1>, vector<32x8xf32>
    %cst_14 = arith.constant dense<0xFF800000> : vector<32xf32>
    %17 = vector.multi_reduction <maximumf>, %16, %cst_14 [1] : vector<32x8xf32> to vector<32xf32>
    %18 = vector.shape_cast %17 : vector<32xf32> to vector<32x1xf32>
    %19 = vector.broadcast %18 : vector<32x1xf32> to vector<32x8xf32>
    %20 = arith.subf %16, %19 : vector<32x8xf32>
    %21 = math.exp %20 : vector<32x8xf32>
    %cst_15 = arith.constant dense<0.000000e+00> : vector<32xf32>
    %22 = vector.multi_reduction <add>, %21, %cst_15 [1] : vector<32x8xf32> to vector<32xf32>
    %23 = vector.shape_cast %22 : vector<32xf32> to vector<32x1xf32>
    %24 = tpu.reciprocal %23 {approx = true} : vector<32x1xf32> -> vector<32x1xf32>
    %25 = vector.broadcast %24 : vector<32x1xf32> to vector<32x8xf32>
    %26 = arith.mulf %21, %25 : vector<32x8xf32>
    %cst_16 = arith.constant dense<0.000000e+00> : vector<32x32xf32>
    %27 = tpu.matmul %26, %5, %cst_16 {dimension_numbers = #tpu.dot_dimension_numbers<[1], [0], [0], [1], [0, 0, 1, 1], [], []>} : vector<32x8xf32>, vector<8x32xf32>, vector<32x32xf32> -> vector<32x32xf32>
    %c0_17 = arith.constant 0 : index
    %c0_18 = arith.constant 0 : index
    %c0_19 = arith.constant 0 : index
    %28 = vector.load %arg7[%c0_17, %c0_18, %c0_19] : memref<1x32x32xf32, #tpu.memory_space<vmem>>, vector<1x32x32xf32>
    %29 = vector.shape_cast %28 : vector<1x32x32xf32> to vector<32x32xf32>
    %30 = vector.shape_cast %27 : vector<32x32xf32> to vector<1x32x32xf32>
    tpu.vector_store %arg7[%c0_17, %c0_18, %c0_19], %30 {strides = array<i32>} : memref<1x32x32xf32, #tpu.memory_space<vmem>>, vector<1x32x32xf32>,
    %c0_20 = arith.constant 0 : index
    %c0_21 = arith.constant 0 : index
    %c0_22 = arith.constant 0 : index
    %31 = vector.load %arg8[%c0_20, %c0_21, %c0_22] : memref<1x32x8xf32, #tpu.memory_space<vmem>>, vector<1x32x8xf32>
    %32 = vector.shape_cast %31 : vector<1x32x8xf32> to vector<32x8xf32>
    %33 = vector.shape_cast %26 : vector<32x8xf32> to vector<1x32x8xf32>
    tpu.vector_store %arg8[%c0_20, %c0_21, %c0_22], %33 {strides = array<i32>} : memref<1x32x8xf32, #tpu.memory_space<vmem>>, vector<1x32x8xf32>,
    return
  }
  func.func @transform_0(%arg0: i32, %arg1: i32) -> (i32, i32, i32) {
    %c0_i32 = arith.constant 0 : i32
    %c0_i32_0 = arith.constant 0 : i32
    return %arg0, %arg1, %c0_i32 : i32, i32, i32
  }
  func.func @transform_1(%arg0: i32, %arg1: i32) -> (i32, i32) {
    %c0_i32 = arith.constant 0 : i32
    %c0_i32_0 = arith.constant 0 : i32
    %c0_i32_1 = arith.constant 0 : i32
    return %c0_i32, %c0_i32_0 : i32, i32
  }
  func.func @transform_2(%arg0: i32, %arg1: i32) -> (i32, i32) {
    %c0_i32 = arith.constant 0 : i32
    %c0_i32_0 = arith.constant 0 : i32
    %c0_i32_1 = arith.constant 0 : i32
    return %c0_i32, %c0_i32_0 : i32, i32
  }
  func.func @transform_3(%arg0: i32, %arg1: i32) -> (i32, i32, i32) {
    %c0_i32 = arith.constant 0 : i32
    %c0_i32_0 = arith.constant 0 : i32
    %c0_i32_1 = arith.constant 0 : i32
    return %arg0, %c0_i32, %c0_i32_0 : i32, i32, i32
  }
  func.func @transform_4(%arg0: i32, %arg1: i32) -> (i32, i32, i32) {
    %c0_i32 = arith.constant 0 : i32
    %c0_i32_0 = arith.constant 0 : i32
    return %arg0, %arg1, %c0_i32 : i32, i32, i32
  }
  func.func @transform_5(%arg0: i32, %arg1: i32) -> (i32, i32, i32) {
    %c0_i32 = arith.constant 0 : i32
    %c0_i32_0 = arith.constant 0 : i32
    return %arg0, %arg1, %c0_i32 : i32, i32, i32
  }
  func.func @transform_6(%arg0: i32, %arg1: i32) -> (i32, i32, i32) {
    %c0_i32 = arith.constant 0 : i32
    %c0_i32_0 = arith.constant 0 : i32
    return %arg0, %arg1, %c0_i32 : i32, i32, i32
  }
}

</mosaic_0001>

<bundles_post_ra>
// kernel: tpu_custom_call.1
= control target key start
LH: loop header
LB: loop body
LE: loop exit
PB: predicated region body
PF: predicated region fallthrough
CT: control target
= control target key end

     0   :  { %s1148_s21 = smov 0   ;;  %s1150_s22 = smov 0   ;;  %s1262_s0 = inlined_call_operand.vmem [shape: f32[2,64,32], index: 0, kind: input, shape index: {}]   ;;  %s1263_s1 = inlined_call_operand.vmem [shape: f32[32,32], index: 1, kind: input, shape index: {}]   ;;  %s1264_s2 = inlined_call_operand.vmem [shape: f32[1,32], index: 2, kind: input, shape index: {}]   ;;  %s1265_s3 = inlined_call_operand.vmem [shape: f32[2,8,32], index: 3, kind: input, shape index: {}]   ;;  %s1266_s4 = inlined_call_operand.vmem [shape: s8[2,64,8], index: 4, kind: input, shape index: {}]   ;;  %s1267_s5 = inlined_call_operand.vmem [shape: f32[2,64,32], index: 5, kind: output, shape index: {0}]   ;;  %s1268_s6 = inlined_call_operand.vmem [shape: f32[2,64,8], index: 6, kind: output, shape index: {1}]  }
   0x1   :  { %s1152_s23 = smov 0   ;;  %s1154_s24 = smov 0  }
   0x2   :  { %s1156_s25 = smov 0  }
   0x3 LB: > { %s26_s26 = sadd.s32 1, %s1103_s23  ;;  %s29_s27 = sadd.s32 1, %s1107_s24  ;;  %s1111_s25 = sphi %s1156_s25, %s17_s25   ;;  %s1107_s24 = sphi %s1154_s24, %s1272_s24   ;;  %s1103_s23 = sphi %s1152_s23, %s1271_s23   ;;  %s1099_s22 = sphi %s1150_s22, %s1270_s22   ;;  %s1095_s21 = sphi %s1148_s21, %s1269_s21  }
   0x4   : > { %p27_p0 = scmp.ge.s32.totalorder %s26_s26, 2  ;;  %p922_p1 = scmp.ge.s32.totalorder %s1111_s25, 1 }
   0x5   : > { %p264_p2 = scmp.lt.s32.totalorder %s1111_s25, 5 }
   0x6   : > { %s1274_s26 = smov (%p27_p0, %s26_s26), 0  ;;  %s1276_s27 = smov (!%p27_p0, %s29_s27), %s1107_s24 }
   0x7   : > { %p265_p3 = pnand %p922_p1, %p264_p2  ;;  %p31_p4 = scmp.ge.s32.totalorder %s1276_s27, 2 }
   0x8   : > { %v372_v0 = vld [vmem:[%s1263_s1] sm:$0xff] (!%p265_p3)  ;;  %v373_v1 = vld [vmem:[%s1263_s1 + $0x8] sm:$0xff] (!%p265_p3)  ;;  %v374_v2 = vld [vmem:[%s1263_s1 + $0x10] sm:$0xff] (!%p265_p3)  ;;  %s923_s10 = sshll.u32 (!%p265_p3), %s1095_s21, 2  ;;  %p325_p5 = scmp.lt.s32.totalorder (!%p265_p3), %s1099_s22, 1  ;;  %vm384_vm0 = vcmask (!%p265_p3), 261120  }
   0x9   : > { %s1278_s27 = smov (%p31_p4, %s1276_s27), 0  ;;  %268 = sbr.rel (%p265_p3) target bundleno = 989 (0x3dd), region = 40 }
   0xa   : > { %v1008_v3 = vpack.c.bf16 (!%p265_p3), %v373_v1, %v372_v0  ;;  %v375_v4 = vld [vmem:[%s1263_s1 + $0x18] sm:$0xff] (!%p265_p3)  ;;  %p327_p6 = scmp.lt.s32.totalorder (!%p265_p3), %s923_s10, 7  ;;  %v936_v11 = vld [vmem:[%s1264_s2] ss:$0 sm:$0xff] (!%p265_p3)  ;;  %vm598_vm2 = vcmask (!%p265_p3), 64512  }
   0xb   : > { %v1012_v5 = vpack.c.bf16 (!%p265_p3), %v375_v4, %v374_v2 }
   0xc   : > { %1009 = vmatprep.subr.bf16.mxu0 (!%p265_p3), %v1008_v3 }
   0xd   : > { %1011 = vmatpush3.bf16.msra.mxu0 (!%p265_p3), %v1008_v3 }
   0xe   : > { %1013 = vmatprep.subr.bf16.mxu0 (!%p265_p3), %v1012_v5 }
  0x10   : > { %s1280_s22 = smov (!%p325_p5, %s1099_s22), 1  ;;  %s1282_s10 = smov (!%p327_p6, %s923_s10), 7 }
  0x11   : > { %s924_s13 = sshll.u32 %s1280_s22, 3  ;;  %1015 = vmatpush3.bf16.msra.mxu0 %v1012_v5 }
  0x12   : > { %s1190_s14 = sadd.s32 %s924_s13, %s1282_s10  ;;  %s337_s21 = scalar_lea.vmem %s1265_s3, %s924_s13 }
  0x13   : > { %s1193_s15 = sshll.u32 %s1190_s14, 3  ;;  %v377_v10 = vld [vmem:[%s337_s21] sm:$0xff]  ;;  %s929_s29 = sshll.u32 %s1190_s14, 1 }
  0x14   : > { %s332_s18 = scalar_lea.vmem %s1262_s0, %s1193_s15  ;;  %992 = vmatprep.subr.msk.mxu1 %vm384_vm0, %v377_v10  ;;  %s346_s8 = scalar_lea.vmem %s1266_s4, %s929_s29 }
  0x15   : > { %v368_v6 = vld [vmem:[%s332_s18] sm:$0xff]  ;;  %v369_v7 = vld [vmem:[%s332_s18 + $0x8] sm:$0xff]  ;;  %v370_v8 = vld [vmem:[%s332_s18 + $0x10] sm:$0xff]  ;;  %993 = vmatpush3.xpose.msk.msra.mxu1 %vm384_vm0, %v377_v10  ;;  %s366_s11 = scalar_lea.vmem %s1268_s6, %s1193_s15  ;;  %s356_s14 = scalar_lea.vmem %s1267_s5, %s1193_s15 }
  0x16   : > { %986 = vmatprep.mubr.msk.f32.mxu0 %vm384_vm0, %v368_v6  ;;  %v371_v9 = vld [vmem:[%s332_s18 + $0x18] sm:$0xff]  ;;  %1000 = vmatprep.subr.mxu1 %v377_v10  ;;  %v953_v20 = vld [vmem:[%s346_s8] sm:$0xff]  }
  0x17   : > { %987 = vmatmul.mubr.msk.f32.vlgmr.msra.gmra.mrb[0].mxu0 %vm384_vm0, %v369_v7  ;;  %v954_v21 = vunpack.c.0.s8 %v953_v20  ;;  %v955_v22 = vunpack.c.1.s8 %v953_v20  ;;  %v958_v23 = vunpack.c.2.s8 %v953_v20  ;;  %v959_v26 = vunpack.c.3.s8 %v953_v20 }
  0x18   : > { %989 = vmatprep.mubr.msk.f32.mxu0 %vm384_vm0, %v370_v8 }
  0x19   : > { %vm590_vm1 = vcmp.eq.s32.totalorder %v954_v21, 0  ;;  %vm591_vm3 = vcmp.eq.s32.totalorder %v955_v22, 0  ;;  %vm592_vm4 = vcmp.eq.s32.totalorder %v958_v23, 0  ;;  %vm593_vm5 = vcmp.eq.s32.totalorder %v959_v26, 0 }
  0x1b   : > { %990 = vmatmul.mubr.msk.f32.gmra.mrb[2].mxu0 %vm384_vm0, %v371_v9 }
  0xea   : > { %v988_v12 = vpop.f32.mrb[0].mxu0 }
  0xeb   : > { %v463_v13 = vpop.f32.mrb[1].mxu0  ;;  %v469_v15 = vadd.f32 %v988_v12, %v936_v11 }
  0xec   : > { %v464_v14 = vadd.f32 %v936_v11, %v463_v13 }
  0xee   : > { %v991_v16 = vpop.f32.mrb[2].mxu0  ;;  %994 = vmatprep.mubr.msk.f32.mxu1 %vm384_vm0, %v464_v14 }
  0xef   : > { %v473_v17 = vpop.f32.mrb[3].mxu0  ;;  %995 = vmatmul.mubr.msk.f32.vlgmr.msra.gmra.mrb[0].mxu1 %vm384_vm0, %v469_v15  ;;  %v479_v19 = vadd.f32 %v991_v16, %v936_v11 }
  0xf0   : > { %v474_v18 = vadd.f32 %v936_v11, %v473_v17  ;;  %1001 = vmatpush3.msra.mxu1 %v377_v10 }
  0xf2   : > { %997 = vmatprep.mubr.msk.f32.mxu1 %vm384_vm0, %v474_v18 }
  0xf3   : > { %998 = vmatmul.mubr.msk.f32.gmra.mrb[2].mxu1 %vm384_vm0, %v479_v19 }
 0x1c2   : > { %v996_v24 = vpop.f32.mrb[0].mxu1 }
 0x1c3   : > { %v563_v25 = vpop.f32.mrb[1].mxu1  ;;  %v595_v29 = vsel %vm591_vm3, -1e+10, %v996_v24 }
 0x1c4   : > { %v594_v27 = vsel %vm590_vm1, -1e+10, %v563_v25  ;;  %v602_v33 = vsel %vm598_vm2, %v595_v29, -inf }
 0x1c5   : > { %v599_v28 = vsel %vm598_vm2, %v594_v27, -inf }
 0x1c6   : > { %600 = vmax.xlane.f32.xlu0 %v599_v28  ;;  %v999_v30 = vpop.f32.mrb[2].mxu1 }
 0x1c7   : > { %v573_v31 = vpop.f32.mrb[3].mxu1  ;;  %v597_v35 = vsel %vm593_vm5, -1e+10, %v999_v30 }
 0x1c8   : > { %v596_v32 = vsel %vm592_vm4, -1e+10, %v573_v31  ;;  %v608_v36 = vsel %vm598_vm2, %v597_v35, -inf }
 0x1c9   : > { %v605_v34 = vsel %vm598_vm2, %v596_v32, -inf }
 0x1ca   : > { %603 = vmax.xlane.f32.xlu0 %v602_v33  ;;  %606 = vmax.xlane.f32.xlu1 %v605_v34 }
 0x1ce   : > { %609 = vmax.xlane.f32.xlu1 %v608_v36 }
 0x253   : > { %v601_v37 = vpop.xlane.xlu0 %600 }
 0x254   : > { %v611_v38 = vsub.f32 %v594_v27, %v601_v37 }
 0x256   : > { %v615_v39 = vmul.f32 1.442695, %v611_v38 }
 0x257   : > { %v604_v40 = vpop.xlane.xlu0 %603  ;;  %v607_v41 = vpop.xlane.xlu1 %606 }
 0x258   : > { %1057 = vpow2.f32 %v615_v39  ;;  %v612_v42 = vsub.f32 %v595_v29, %v604_v40  ;;  %v613_v43 = vsub.f32 %v596_v32, %v607_v41 }
 0x25a   : > { %v617_v44 = vmul.f32 1.442695, %v612_v42  ;;  %v619_v45 = vmul.f32 1.442695, %v613_v43 }
 0x25b   : > { %v610_v46 = vpop.xlane.xlu1 %609 }
 0x25c   : > { %1059 = vpow2.f32 %v617_v44  ;;  %v614_v47 = vsub.f32 %v597_v35, %v610_v46 }
 0x25d   : > { %1061 = vpow2.f32 %v619_v45 }
 0x25e   : > { %v621_v48 = vmul.f32 1.442695, %v614_v47 }
 0x260   : > { %1063 = vpow2.f32 %v621_v48 }
 0x262   : > { %v1058_v49 = vpop.eup %1057 }
 0x263   : > { %v623_v50 = vsel %vm598_vm2, %v1058_v49, 0.0 }
 0x264   : > { %624 = vadd.xlane.f32.xlu0 %v623_v50 }
 0x266   : > { %v1060_v51 = vpop.eup %1059 }
 0x267   : > { %v1062_v52 = vpop.eup %1061  ;;  %v626_v53 = vsel %vm598_vm2, %v1060_v51, 0.0 }
 0x268   : > { %627 = vadd.xlane.f32.xlu1 %v626_v53  ;;  %v629_v54 = vsel %vm598_vm2, %v1062_v52, 0.0 }
 0x269   : > { %630 = vadd.xlane.f32.xlu0 %v629_v54 }
 0x26a   : > { %v1064_v55 = vpop.eup %1063 }
 0x26b   : > { %v632_v56 = vsel %vm598_vm2, %v1064_v55, 0.0 }
 0x26c   : > { %633 = vadd.xlane.f32.xlu1 %v632_v56 }
 0x2f1   : > { %v625_v57 = vpop.xlane.xlu0 %624 }
 0x2f2   : > { %1065 = vrcp.f32 %v625_v57 }
 0x2f5   : > { %v628_v58 = vpop.xlane.xlu1 %627 }
 0x2f6   : > { %v631_v59 = vpop.xlane.xlu0 %630  ;;  %1067 = vrcp.f32 %v628_v58 }
 0x2f7   : > { %1069 = vrcp.f32 %v631_v59 }
 0x2f9   : > { %v634_v60 = vpop.xlane.xlu1 %633 }
 0x2fa   : > { %1071 = vrcp.f32 %v634_v60 }
 0x2fc   : > { %v1066_v61 = vpop.eup %1065 }
 0x2fd   : > { %v639_v62 = vmul.f32 %v1066_v61, %v1058_v49 }
 0x2ff   : > { %1002 = vmatprep.mubr.msk.f32.mxu1 %vm598_vm2, %v639_v62  ;;  %744 = vst.msk [vmem:[%s366_s11] sm:$0xff] %vm598_vm2, %v639_v62 }
 0x300   : > { %v1068_v63 = vpop.eup %1067 }
 0x301   : > { %v1070_v0 = vpop.eup %1069  ;;  %v640_v1 = vmul.f32 %v1068_v63, %v1060_v51 }
 0x302   : > { %v641_v2 = vmul.f32 %v1070_v0, %v1062_v52 }
 0x303   : > { %745 = vst.msk [vmem:[%s366_s11 + $0x8] sm:$0xff] %vm598_vm2, %v640_v1  ;;  %1003 = vmatmul.mubr.msk.f32.vlgmr.msra.gmra.mrb[4].mxu1 %vm598_vm2, %v640_v1 }
 0x304   : > { %v1072_v3 = vpop.eup %1071  ;;  %1005 = vmatprep.mubr.msk.f32.mxu1 %vm598_vm2, %v641_v2  ;;  %746 = vst.msk [vmem:[%s366_s11 + $0x10] sm:$0xff] %vm598_vm2, %v641_v2 }
 0x305   : > { %v642_v4 = vmul.f32 %v1072_v3, %v1064_v55 }
 0x307   : > { %1006 = vmatmul.mubr.msk.f32.gmra.mrb[6].mxu1 %vm598_vm2, %v642_v4  ;;  %747 = vst.msk [vmem:[%s366_s11 + $0x18] sm:$0xff] %vm598_vm2, %v642_v4 }
 0x3d6   : > { %v1004_v5 = vpop.f32.mrb[4].mxu1 }
 0x3d7   : > { %741 = vst.msk [vmem:[%s356_s14 + $0x8] sm:$0xff] %vm384_vm0, %v1004_v5  ;;  %v721_v6 = vpop.f32.mrb[5].mxu1 }
 0x3d8   : > { %740 = vst.msk [vmem:[%s356_s14] sm:$0xff] %vm384_vm0, %v721_v6 }
 0x3da   : > { %v1007_v7 = vpop.f32.mrb[6].mxu1 }
 0x3db   : > { %743 = vst.msk [vmem:[%s356_s14 + $0x18] sm:$0xff] %vm384_vm0, %v1007_v7  ;;  %v731_v8 = vpop.f32.mrb[7].mxu1 }
 0x3dc   : > { %742 = vst.msk [vmem:[%s356_s14 + $0x10] sm:$0xff] %vm384_vm0, %v731_v8 }
 0x3dd PF: > { %s17_s25 = sadd.s32 1, %s1111_s25   ;;  %s1269_s21 = smov %s1103_s23 }
 0x3de   : > { %p14_p7 = scmp.ge.s32.totalorder %s17_s25, 6   ;;  %s1270_s22 = smov %s1107_s24 }
 0x3df   : > { %s1271_s23 = smov %s1274_s26  ;;  %s1272_s24 = smov %s1278_s27 }
 0x3e0   :  { %16 = sbr.rel (!%p14_p7) target bundleno = 3 (0x3), region = 88 }

</bundles_post_ra>
